<compile_context>
chip_gen: v5e
topology: v5e:2x2
jax: 0.10.0
libtpu: 0.0.40
codegen_flags: <defaults>
</compile_context>

<pallas_src>
import functools
import math

import jax
import jax.numpy as jnp
import numpy as np
from jax.experimental import pallas as pl
from jax.experimental.pallas import tpu as pltpu


def _norm_act_conv_kernel(x_ref, scale_ref, shift_ref, w_ref, mask_ref, o_ref,
                          y_scr, *, tap_shifts, center_tap, mxu_dtype, unroll):
    # x_ref:     (nb, R, HW)        R = g*Cin image-channel rows (lane axis = H*W)
    # scale_ref: (R, 1)             folded BN scale = gamma / sqrt(var + eps)
    # shift_ref: (R, 1)             folded BN shift = beta - mean * scale
    # w_ref:     (g*Cout, T*R)      block-diagonal stacked conv weights (T = KH*KW taps)
    # mask_ref:  (T, R, HW)         0/1 tap validity, pre-broadcast over rows
    # o_ref:     (nb, g*Cout, HW)
    # y_scr:     (nb, R, HW) f32    VMEM scratch holding BN+ReLU of the whole block
    nb = x_ref.shape[0]
    n_taps = len(tap_shifts)

    # Loop-invariant small operands: read once per grid step.
    scale = scale_ref[...]          # (R, 1)
    shift = shift_ref[...]          # (R, 1)
    w = w_ref[...]                  # (g*Cout, T*R), mxu_dtype
    masks = mask_ref[...]           # (T, R, HW) f32

    # Fused BatchNorm(eval) affine + ReLU for the WHOLE block, once per grid step
    # (single broadcast of scale/shift; VPU, lane-dense over H*W).
    y_scr[...] = jnp.maximum(x_ref[...] * scale[None] + shift[None], 0.0)

    def body(i, carry):
        y = y_scr[i]                                              # (R, HW) f32
        # Build the stacked activation: each conv tap is a static XLU lane roll of the
        # flattened H*W axis plus a 0/1 validity mask (zero padding).  Center tap needs
        # neither.  Rows are ordered [tap, group-member, channel] to match w_ref.
        pieces = []
        for t in range(n_taps):
            s = tap_shifts[t]
            p = y if s == 0 else pltpu.roll(y, shift=s, axis=1)
            if t != center_tap:
                p = p * masks[t]
            pieces.append(p)
        stacked = jnp.concatenate(pieces, axis=0).astype(mxu_dtype)   # (T*R, HW)
        # One MXU matmul per image group: (g*Cout, T*R) @ (T*R, HW), f32 accumulate.
        o_ref[i] = jnp.dot(w, stacked,
                           preferred_element_type=jnp.float32).astype(o_ref.dtype)
        return carry

    jax.lax.fori_loop(0, nb, body, 0, unroll=unroll)


def norm_act_conv(x_nchw, gamma, beta, running_mean, running_var, w_oihw,
                  eps=1e-5, stride=1, padding=None, compute_dtype=jnp.bfloat16):
    """Fused BatchNorm2d(eval) -> ReLU -> Conv2d(stride=1, 'same' padding, bias=False)."""
    N, Cin, H, W = x_nchw.shape
    Cout, Cin_w, KH, KW = w_oihw.shape
    assert Cin_w == Cin
    PH, PW = (KH - 1) // 2, (KW - 1) // 2
    if padding is None:
        padding = (PH, PW)
    elif isinstance(padding, int):
        padding = (padding, padding)
    # TODO(synk): only stride=1 with odd-kernel 'same' padding is implemented here.
    if stride != 1 or tuple(padding) != (PH, PW) or KH % 2 == 0 or KW % 2 == 0:
        raise NotImplementedError(
            "norm_act_conv kernel supports stride=1, odd kernel, 'same' padding")
    HW = H * W
    n_taps = KH * KW
    center_tap = PH * KW + PW

    # ---- glue (all cheap / free): fold BN into per-channel affine ----------
    inv_std = 1.0 / jnp.sqrt(running_var.astype(jnp.float32) + eps)
    scale = gamma.astype(jnp.float32) * inv_std                     # (Cin,)
    shift = beta.astype(jnp.float32) - running_mean.astype(jnp.float32) * scale

    # Sublane packing: g images per 8-sublane group when Cin divides 8 (free reshape).
    g = 1
    if Cin <= 8 and 8 % Cin == 0:
        g = max(1, math.gcd(8 // Cin, N))
    Ng = N // g
    R = g * Cin

    # Channel-major, lane-dense working layout: free reshape of NCHW (no transpose pass).
    x3 = x_nchw.astype(jnp.float32).reshape(Ng, R, HW)
    scale_g = jnp.tile(scale.reshape(Cin, 1), (g, 1))               # (R, 1)
    shift_g = jnp.tile(shift.reshape(Cin, 1), (g, 1))               # (R, 1)

    # Per-tap weights -> lane-dense block-diagonal (g*Cout, n_taps*R) matrix whose
    # column order matches the in-kernel concatenation order [tap, member, channel].
    w_tap = jnp.transpose(w_oihw.astype(jnp.float32), (2, 3, 0, 1)).reshape(n_taps, Cout, Cin)
    eye_g = jnp.eye(g, dtype=jnp.float32)
    w_stk = jnp.einsum("toc,jk->jotkc", w_tap, eye_g).reshape(g * Cout, n_taps * R)
    w_stk = w_stk.astype(compute_dtype)

    # Static per-tap lane shifts + 0/1 validity masks over the flattened H*W axis,
    # pre-broadcast to all R rows in the wrapper (no in-kernel broadcast per image).
    h_idx = np.arange(HW) // W
    w_idx = np.arange(HW) % W
    tap_shifts, tap_masks = [], []
    for kh in range(KH):
        for kw in range(KW):
            dh, dw = kh - PH, kw - PW
            tap_shifts.append(int((-(dh * W + dw)) % HW))
            tap_masks.append((h_idx + dh >= 0) & (h_idx + dh < H) &
                             (w_idx + dw >= 0) & (w_idx + dw < W))
    mask_np = np.stack(tap_masks).astype(np.float32)                # (n_taps, HW)
    mask = jnp.asarray(np.broadcast_to(mask_np[:, None, :], (n_taps, R, HW)).copy())

    # Batch-block sizing: a few MiB of x+out per grid step amortizes the ~0.35us/step
    # overhead; keep the total (double-buffered blocks + y scratch) under v5e's 16 MiB
    # scoped-VMEM default.  Keep the grid even when >1 so v7x's two TCs stay balanced.
    bytes_per_grp = (R + max(g * Cout, 8)) * HW * 4
    target_bytes = 3 << 20
    nb = max(1, min(Ng, target_bytes // max(1, bytes_per_grp)))
    n_steps = pl.cdiv(Ng, nb)
    if n_steps > 1 and n_steps % 2:
        n_steps += 1
        nb = pl.cdiv(Ng, n_steps)
    grid = (pl.cdiv(Ng, nb),)
    # TODO(synk): when Ng % nb != 0 the ragged last block reads (discarded) OOB rows.

    kernel = functools.partial(
        _norm_act_conv_kernel,
        tap_shifts=tuple(tap_shifts), center_tap=center_tap,
        mxu_dtype=compute_dtype, unroll=bool(nb <= 8))

    # Rough VMEM estimate (double-buffered blocks + y scratch + temporaries); only
    # raise the scoped-VMEM limit if we would actually exceed the smallest default.
    vmem_est = 3 * nb * bytes_per_grp + (1 << 20)
    cparams = pltpu.CompilerParams(
        dimension_semantics=("parallel",),
        vmem_limit_bytes=int(min(2 * vmem_est, 48 << 20)) if vmem_est > (14 << 20) else None)

    out3 = pl.pallas_call(
        kernel,
        out_shape=jax.ShapeDtypeStruct((Ng, g * Cout, HW), jnp.float32),
        grid=grid,
        in_specs=[
            pl.BlockSpec((nb, R, HW), lambda b: (b, 0, 0)),            # x block
            pl.BlockSpec((R, 1), lambda b: (0, 0)),                    # BN scale (resident)
            pl.BlockSpec((R, 1), lambda b: (0, 0)),                    # BN shift (resident)
            pl.BlockSpec((g * Cout, n_taps * R), lambda b: (0, 0)),    # stacked weights (resident)
            pl.BlockSpec((n_taps, R, HW), lambda b: (0, 0, 0)),        # tap masks (resident)
        ],
        out_specs=pl.BlockSpec((nb, g * Cout, HW), lambda b: (b, 0, 0)),
        scratch_shapes=[pltpu.VMEM((nb, R, HW), jnp.float32)],         # BN+ReLU block scratch
        compiler_params=cparams,
    )(x3, scale_g, shift_g, w_stk, mask)

    # Free reshape back to NCHW.
    return out3.reshape(N, Cout, H, W)


if __name__ == "__main__":
    # Small deterministic setup: N=2, Cin=4, H=W=16, Cout=8, k=3, stride=1, pad=1
    key = jax.random.PRNGKey(0)
    k_x, k_w, k_g, k_b, k_m, k_v = jax.random.split(key, 6)

    N, Cin, H, W = 2, 4, 16, 16
    Cout, K = 8, 3

    x = jax.random.normal(k_x, (N, Cin, H, W), dtype=jnp.float32)
    w = jax.random.normal(k_w, (Cout, Cin, K, K), dtype=jnp.float32) * 0.1
    gamma = 1.0 + 0.1 * jax.random.normal(k_g, (Cin,), dtype=jnp.float32)
    beta = 0.1 * jax.random.normal(k_b, (Cin,), dtype=jnp.float32)
    running_mean = 0.1 * jax.random.normal(k_m, (Cin,), dtype=jnp.float32)
    running_var = jnp.abs(1.0 + 0.1 * jax.random.normal(k_v, (Cin,), dtype=jnp.float32))

    out = norm_act_conv(x, gamma, beta, running_mean, running_var, w)
    out = jax.block_until_ready(out)

    # pure-JAX f32 reference for correctness
    eps = 1e-5
    inv_std = 1.0 / jnp.sqrt(running_var + eps)
    y = (x - running_mean[None, :, None, None]) * inv_std[None, :, None, None]
    y = y * gamma[None, :, None, None] + beta[None, :, None, None]
    y = jnp.maximum(y, 0.0)
    ref = jax.lax.conv_general_dilated(
        y, w, window_strides=(1, 1), padding=((1, 1), (1, 1)),
        dimension_numbers=("NCHW", "OIHW", "NCHW"),
        precision=jax.lax.Precision.HIGHEST)

    assert out.shape == (N, Cout, H, W), out.shape
    err = float(jnp.max(jnp.abs(out - ref)))
    # bf16 MXU operands with f32 accumulation: tolerance loosened accordingly.
    assert err < 3e-2, err
    print("KERNEL_OK")
</pallas_src>

<mosaic_0001>
module attributes {stable_mosaic.version = 11 : i64} {
  func.func @_norm_act_conv_kernel(%arg0: i32, %arg1: memref<1x8x256xf32, #tpu.memory_space<vmem>>, %arg2: memref<8x1xf32, #tpu.memory_space<vmem>>, %arg3: memref<8x1xf32, #tpu.memory_space<vmem>>, %arg4: memref<16x72xbf16, #tpu.memory_space<vmem>>, %arg5: memref<9x8x256xf32, #tpu.memory_space<vmem>>, %arg6: memref<1x16x256xf32, #tpu.memory_space<vmem>>, %arg7: memref<1x8x256xf32, #tpu.memory_space<vmem>>) attributes {dimension_semantics = [#tpu.dimension_semantics<parallel>], iteration_bounds = array<i64: 1>, scalar_prefetch = 0 : i64, scratch_operands = 1 : i64, tpu.core_type = #tpu.core_type<tc>, window_params = [{transform_indices = @transform_0, window_bounds = array<i64: 1, 8, 256>}, {pipeline_mode = #tpu.pipeline_mode<synchronous>, transform_indices = @transform_1, window_bounds = array<i64: 8, 1>}, {pipeline_mode = #tpu.pipeline_mode<synchronous>, transform_indices = @transform_2, window_bounds = array<i64: 8, 1>}, {pipeline_mode = #tpu.pipeline_mode<synchronous>, transform_indices = @transform_3, window_bounds = array<i64: 16, 72>}, {pipeline_mode = #tpu.pipeline_mode<synchronous>, transform_indices = @transform_4, window_bounds = array<i64: 9, 8, 256>}, {transform_indices = @transform_5, window_bounds = array<i64: 1, 16, 256>}]} {
    %c0 = arith.constant 0 : index
    %c0_0 = arith.constant 0 : index
    %0 = vector.load %arg2[%c0, %c0_0] : memref<8x1xf32, #tpu.memory_space<vmem>>, vector<8x1xf32>
    %c0_1 = arith.constant 0 : index
    %c0_2 = arith.constant 0 : index
    %1 = vector.load %arg3[%c0_1, %c0_2] : memref<8x1xf32, #tpu.memory_space<vmem>>, vector<8x1xf32>
    %c0_3 = arith.constant 0 : index
    %c0_4 = arith.constant 0 : index
    %2 = vector.load %arg4[%c0_3, %c0_4] : memref<16x72xbf16, #tpu.memory_space<vmem>>, vector<16x72xbf16>
    %c0_5 = arith.constant 0 : index
    %c0_6 = arith.constant 0 : index
    %c0_7 = arith.constant 0 : index
    %3 = vector.load %arg5[%c0_5, %c0_6, %c0_7] : memref<9x8x256xf32, #tpu.memory_space<vmem>>, vector<9x8x256xf32>
    %c0_8 = arith.constant 0 : index
    %c0_9 = arith.constant 0 : index
    %c0_10 = arith.constant 0 : index
    %4 = vector.load %arg1[%c0_8, %c0_9, %c0_10] : memref<1x8x256xf32, #tpu.memory_space<vmem>>, vector<1x8x256xf32>
    %5 = vector.shape_cast %0 : vector<8x1xf32> to vector<1x8x1xf32>
    %6 = vector.broadcast %5 : vector<1x8x1xf32> to vector<1x8x256xf32>
    %7 = arith.mulf %4, %6 : vector<1x8x256xf32>
    %8 = vector.shape_cast %1 : vector<8x1xf32> to vector<1x8x1xf32>
    %9 = vector.broadcast %8 : vector<1x8x1xf32> to vector<1x8x256xf32>
    %10 = arith.addf %7, %9 : vector<1x8x256xf32>
    %cst = arith.constant 0.000000e+00 : f32
    %11 = vector.broadcast %cst : f32 to vector<1x8x256xf32>
    %12 = arith.maximumf %10, %11 : vector<1x8x256xf32>
    %c0_11 = arith.constant 0 : index
    %c0_12 = arith.constant 0 : index
    %c0_13 = arith.constant 0 : index
    %13 = vector.load %arg7[%c0_11, %c0_12, %c0_13] : memref<1x8x256xf32, #tpu.memory_space<vmem>>, vector<1x8x256xf32>
    tpu.vector_store %arg7[%c0_11, %c0_12, %c0_13], %12 {strides = array<i32>} : memref<1x8x256xf32, #tpu.memory_space<vmem>>, vector<1x8x256xf32>,
    %c0_i32 = arith.constant 0 : i32
    %14 = arith.index_cast %c0_i32 : i32 to index
    %c0_14 = arith.constant 0 : index
    %c0_15 = arith.constant 0 : index
    %15 = vector.load %arg7[%14, %c0_14, %c0_15] : memref<1x8x256xf32, #tpu.memory_space<vmem>>, vector<1x8x256xf32>
    %16 = vector.shape_cast %15 : vector<1x8x256xf32> to vector<8x256xf32>
    %c17_i32 = arith.constant 17 : i32
    %17 = tpu.dynamic_rotate %16 by %c17_i32 dim 1 : vector<8x256xf32>, i32 -> vector<8x256xf32>
    %18 = vector.extract_strided_slice %3 {offsets = [0, 0, 0], sizes = [1, 8, 256], strides = [1, 1, 1]} : vector<9x8x256xf32> to vector<1x8x256xf32>
    %19 = vector.shape_cast %18 : vector<1x8x256xf32> to vector<8x256xf32>
    %20 = arith.mulf %17, %19 : vector<8x256xf32>
    %c16_i32 = arith.constant 16 : i32
    %21 = tpu.dynamic_rotate %16 by %c16_i32 dim 1 : vector<8x256xf32>, i32 -> vector<8x256xf32>
    %22 = vector.extract_strided_slice %3 {offsets = [1, 0, 0], sizes = [1, 8, 256], strides = [1, 1, 1]} : vector<9x8x256xf32> to vector<1x8x256xf32>
    %23 = vector.shape_cast %22 : vector<1x8x256xf32> to vector<8x256xf32>
    %24 = arith.mulf %21, %23 : vector<8x256xf32>
    %c15_i32 = arith.constant 15 : i32
    %25 = tpu.dynamic_rotate %16 by %c15_i32 dim 1 : vector<8x256xf32>, i32 -> vector<8x256xf32>
    %26 = vector.extract_strided_slice %3 {offsets = [2, 0, 0], sizes = [1, 8, 256], strides = [1, 1, 1]} : vector<9x8x256xf32> to vector<1x8x256xf32>
    %27 = vector.shape_cast %26 : vector<1x8x256xf32> to vector<8x256xf32>
    %28 = arith.mulf %25, %27 : vector<8x256xf32>
    %c1_i32 = arith.constant 1 : i32
    %29 = tpu.dynamic_rotate %16 by %c1_i32 dim 1 : vector<8x256xf32>, i32 -> vector<8x256xf32>
    %30 = vector.extract_strided_slice %3 {offsets = [3, 0, 0], sizes = [1, 8, 256], strides = [1, 1, 1]} : vector<9x8x256xf32> to vector<1x8x256xf32>
    %31 = vector.shape_cast %30 : vector<1x8x256xf32> to vector<8x256xf32>
    %32 = arith.mulf %29, %31 : vector<8x256xf32>
    %c255_i32 = arith.constant 255 : i32
    %33 = tpu.dynamic_rotate %16 by %c255_i32 dim 1 : vector<8x256xf32>, i32 -> vector<8x256xf32>
    %34 = vector.extract_strided_slice %3 {offsets = [5, 0, 0], sizes = [1, 8, 256], strides = [1, 1, 1]} : vector<9x8x256xf32> to vector<1x8x256xf32>
    %35 = vector.shape_cast %34 : vector<1x8x256xf32> to vector<8x256xf32>
    %36 = arith.mulf %33, %35 : vector<8x256xf32>
    %c241_i32 = arith.constant 241 : i32
    %37 = tpu.dynamic_rotate %16 by %c241_i32 dim 1 : vector<8x256xf32>, i32 -> vector<8x256xf32>
    %38 = vector.extract_strided_slice %3 {offsets = [6, 0, 0], sizes = [1, 8, 256], strides = [1, 1, 1]} : vector<9x8x256xf32> to vector<1x8x256xf32>
    %39 = vector.shape_cast %38 : vector<1x8x256xf32> to vector<8x256xf32>
    %40 = arith.mulf %37, %39 : vector<8x256xf32>
    %c240_i32 = arith.constant 240 : i32
    %41 = tpu.dynamic_rotate %16 by %c240_i32 dim 1 : vector<8x256xf32>, i32 -> vector<8x256xf32>
    %42 = vector.extract_strided_slice %3 {offsets = [7, 0, 0], sizes = [1, 8, 256], strides = [1, 1, 1]} : vector<9x8x256xf32> to vector<1x8x256xf32>
    %43 = vector.shape_cast %42 : vector<1x8x256xf32> to vector<8x256xf32>
    %44 = arith.mulf %41, %43 : vector<8x256xf32>
    %c239_i32 = arith.constant 239 : i32
    %45 = tpu.dynamic_rotate %16 by %c239_i32 dim 1 : vector<8x256xf32>, i32 -> vector<8x256xf32>
    %46 = vector.extract_strided_slice %3 {offsets = [8, 0, 0], sizes = [1, 8, 256], strides = [1, 1, 1]} : vector<9x8x256xf32> to vector<1x8x256xf32>
    %47 = vector.shape_cast %46 : vector<1x8x256xf32> to vector<8x256xf32>
    %48 = arith.mulf %45, %47 : vector<8x256xf32>
    %49 = tpu.concatenate %20, %24, %28, %32, %16, %36, %40, %44, %48 in 0 : vector<8x256xf32>, vector<8x256xf32>, vector<8x256xf32>, vector<8x256xf32>, vector<8x256xf32>, vector<8x256xf32>, vector<8x256xf32>, vector<8x256xf32>, vector<8x256xf32> -> vector<72x256xf32>
    %50 = arith.truncf %49 : vector<72x256xf32> to vector<72x256xbf16>
    %cst_16 = arith.constant dense<0.000000e+00> : vector<16x256xf32>
    %51 = tpu.matmul %2, %50, %cst_16 {dimension_numbers = #tpu.dot_dimension_numbers<[1], [0], [0], [1], [0, 0, 1, 1], [], []>} : vector<16x72xbf16>, vector<72x256xbf16>, vector<16x256xf32> -> vector<16x256xf32>
    %52 = arith.index_cast %c0_i32 : i32 to index
    %c0_17 = arith.constant 0 : index
    %c0_18 = arith.constant 0 : index
    %53 = vector.load %arg6[%52, %c0_17, %c0_18] : memref<1x16x256xf32, #tpu.memory_space<vmem>>, vector<1x16x256xf32>
    %54 = vector.shape_cast %53 : vector<1x16x256xf32> to vector<16x256xf32>
    %55 = vector.shape_cast %51 : vector<16x256xf32> to vector<1x16x256xf32>
    tpu.vector_store %arg6[%52, %c0_17, %c0_18], %55 {strides = array<i32>} : memref<1x16x256xf32, #tpu.memory_space<vmem>>, vector<1x16x256xf32>,
    %c1_i32_19 = arith.constant 1 : i32
    return
  }
  func.func @transform_0(%arg0: i32) -> (i32, i32, i32) {
    %c0_i32 = arith.constant 0 : i32
    %c0_i32_0 = arith.constant 0 : i32
    %c0_i32_1 = arith.constant 0 : i32
    return %arg0, %c0_i32, %c0_i32_0 : i32, i32, i32
  }
  func.func @transform_1(%arg0: i32) -> (i32, i32) {
    %c0_i32 = arith.constant 0 : i32
    %c0_i32_0 = arith.constant 0 : i32
    %c0_i32_1 = arith.constant 0 : i32
    return %c0_i32, %c0_i32_0 : i32, i32
  }
  func.func @transform_2(%arg0: i32) -> (i32, i32) {
    %c0_i32 = arith.constant 0 : i32
    %c0_i32_0 = arith.constant 0 : i32
    %c0_i32_1 = arith.constant 0 : i32
    return %c0_i32, %c0_i32_0 : i32, i32
  }
  func.func @transform_3(%arg0: i32) -> (i32, i32) {
    %c0_i32 = arith.constant 0 : i32
    %c0_i32_0 = arith.constant 0 : i32
    %c0_i32_1 = arith.constant 0 : i32
    return %c0_i32, %c0_i32_0 : i32, i32
  }
  func.func @transform_4(%arg0: i32) -> (i32, i32, i32) {
    %c0_i32 = arith.constant 0 : i32
    %c0_i32_0 = arith.constant 0 : i32
    %c0_i32_1 = arith.constant 0 : i32
    %c0_i32_2 = arith.constant 0 : i32
    return %c0_i32, %c0_i32_0, %c0_i32_1 : i32, i32, i32
  }
  func.func @transform_5(%arg0: i32) -> (i32, i32, i32) {
    %c0_i32 = arith.constant 0 : i32
    %c0_i32_0 = arith.constant 0 : i32
    %c0_i32_1 = arith.constant 0 : i32
    return %arg0, %c0_i32, %c0_i32_0 : i32, i32, i32
  }
}

</mosaic_0001>

<bundles_post_ra>
// kernel: tpu_custom_call.1
= control target key start
LH: loop header
LB: loop body
LE: loop exit
PB: predicated region body
PF: predicated region fallthrough
CT: control target
= control target key end

     0   :  { %10 = vsyncpa [#allocation4], 0  ;;  %s459_s0 = inlined_call_operand.vmem [shape: f32[1,8,256], index: 0, kind: input, shape index: {}]   ;;  %s460_s1 = inlined_call_operand.vmem [shape: f32[8,1], index: 1, kind: input, shape index: {}]   ;;  %s461_s2 = inlined_call_operand.vmem [shape: f32[8,1], index: 2, kind: input, shape index: {}]   ;;  %s462_s3 = inlined_call_operand.hbm [shape: bf16[16,72], index: 3, kind: input, shape index: {}]   ;;  %s463_s4 = inlined_call_operand.hbm [shape: f32[9,8,256], index: 4, kind: input, shape index: {}]   ;;  %s464_s5 = inlined_call_operand.hbm [shape: f32[1,16,256], index: 5, kind: output, shape index: {}]  }
   0x1   :  { %11 = vsyncpa [#allocation7], 0 }
   0x2   :  { %12 = vsyncpa [#allocation5], 0  ;;  %s23_s20 = sshll.u32 %s462_s3, 4  ;;  %s349_s21 = smov [#allocation3]   ;;  %s24_s20 = int_to_ptr.hbm [resolvable:$true] %s23_s20 }
   0x3   :  { %s25_s22 = sshll.u32 %s349_s21, 4  ;;  %s36_s25 = sshll.u32 %s463_s4, 4  ;;  %s26_s22 = int_to_ptr.vmem [resolvable:$true] %s25_s22  ;;  %s37_s25 = int_to_ptr.hbm [resolvable:$true] %s36_s25 }
   0x4   :  { %s350_s26 = smov 64   ;;  %s351_s27 = smov 4  }
   0x5   :  { %31 = dma.hbm_to_vmem [thread:$0]  %s24_s20, 128, %s26_s22, [#allocation4], %s350_s26, %s350_s26, %s351_s27  }
   0x6   :  { %s352_s28 = smov [#allocation6]   ;;  %s353_s30 = smov 256  }
   0x7   :  { %s38_s29 = sshll.u32 %s352_s28, 4  ;;  %s354_s6 = smov 16   ;;  %s39_s29 = int_to_ptr.vmem [resolvable:$true] %s38_s29 }
   0x8   :  { %44 = dma.hbm_to_vmem [thread:$0]  %s37_s25, 2304, %s39_s29, [#allocation7], %s353_s30, %s353_s30, %s354_s6  }
   0x9   :  { %343 = dma.done.wait [#allocation4], 128  }
   0xa   :  { %344 = vsyncadd [#allocation4], 4294967168 }
   0xb   :  { %345 = dma.done.wait [#allocation7], 2304  }
   0xc   :  { %346 = vsyncadd [#allocation7], 4294964992  ;;  %v355_v0 = vmov 0   ;;  %v54_v1 = vld [vmem:[%s460_s1] sm:$0xff]  ;;  %v75_v8 = vld [vmem:[%s459_s0 + $0x8] sm:$0xff]  ;;  %s356_s1 = smov 112   ;;  %v100_v14 = vlaneseq }
   0xd   :  { %270 = vset.pattern.permute.xlu0 %v355_v0  ;;  %v55_v2 = vld [vmem:[%s461_s2] sm:$0xff]  ;;  %s357_s2 = smov 113   ;;  %s358_s13 = smov 111   ;;  %v72_v19 = vld [vmem:[#allocation6 + $0x80] sm:$0xff]  ;;  %v73_v20 = vld [vmem:[#allocation6 + $0x88] sm:$0xff]  ;;  %vm189_vm1 = vcmask 1043456  }
   0xe   :  { %78 = vperm.xlu0 %270, %v54_v1   ;;  %v74_v4 = vld [vmem:[%s459_s0] sm:$0xff]  ;;  %s359_s14 = smov 127   ;;  %s360_s0 = smov 1   ;;  %v437_v17 = vand.u32 127, %v100_v14  ;;  %v68_v29 = vld [vmem:[#allocation6 + $0x60] sm:$0xff]  ;;  %v69_v33 = vld [vmem:[#allocation6 + $0x68] sm:$0xff] }
   0xf   :  { %s361_s15 = smov 17   ;;  %s362_s16 = smov 15   ;;  %v70_v36 = vld [vmem:[#allocation6 + $0x70] sm:$0xff]  ;;  %v71_v37 = vld [vmem:[#allocation6 + $0x78] sm:$0xff]  ;;  %v62_v59 = vld [vmem:[#allocation6 + $0x20] sm:$0xff]  ;;  %vm185_vm9 = vcmask 588800  }
  0x10   :  { %vm165_vm0 = vcmp.lt.s32.totalorder %v437_v17, 111  ;;  %vm147_vm2 = vcmp.lt.s32.totalorder %v437_v17, 113  ;;  %vm138_vm3 = vcmp.lt.s32.totalorder %v437_v17, 127  ;;  %vm156_vm4 = vcmp.lt.s32.totalorder %v437_v17, 112  ;;  %v66_v39 = vld [vmem:[#allocation6 + $0x50] sm:$0xff]  ;;  %v67_v40 = vld [vmem:[#allocation6 + $0x58] sm:$0xff] }
  0x11   :  { %vm120_vm5 = vcmp.lt.s32.totalorder %v437_v17, 15  ;;  %vm129_vm6 = vcmp.lt.s32.totalorder %v437_v17, 1  ;;  %v63_v60 = vld [vmem:[#allocation6 + $0x28] sm:$0xff]  ;;  %v64_v63 = vld [vmem:[#allocation6 + $0x30] sm:$0xff]  ;;  %v65_v0 = vld [vmem:[#allocation6 + $0x38] sm:$0xff]  ;;  %vm102_vm7 = vcmp.lt.s32.totalorder %v437_v17, 17 }
  0x12   :  { %vm111_vm8 = vcmp.lt.s32.totalorder %v437_v17, 16  ;;  %s363_s17 = smov [#allocation8]   ;;  %s234_s21 = sshll.u32 %s464_s5, 4  ;;  %s235_s21 = int_to_ptr.hbm [resolvable:$true] %s234_s21 }
  0x13   :  { %s232_s18 = sshll.u32 %s363_s17, 4  ;;  %s233_s18 = int_to_ptr.vmem [resolvable:$true] %s232_s18 }
  0x16   :  { %85 = vperm.xlu0 %270, %v55_v2  }
  0x80   :  { %v79_v3 = vpop.permute.xlu0 %78 }
  0x81   :  { %v81_v5 = vmul.f32 %v79_v3, %v74_v4  ;;  %v82_v10 = vmul.f32 %v79_v3, %v75_v8 }
  0x88   :  { %v86_v6 = vpop.permute.xlu0 %85 }
  0x89   :  { %v88_v7 = vadd.f32 %v86_v6, %v81_v5  ;;  %v89_v11 = vadd.f32 %v86_v6, %v82_v10 }
  0x8b   :  { %v415_v9 = vmax.f32 %v88_v7, 0.0  ;;  %v420_v12 = vmax.f32 %v89_v11, 0.0  ;;  %v58_v11 = vld [vmem:[#allocation6] sm:$0xff] }
  0x8d   :  { %152 = vrot.lane.b32.xlu0 %v415_v9, %s356_s1  ;;  %143 = vrot.lane.b32.xlu2 %v415_v9, %s357_s2 }
  0x8e   :  { %161 = vrot.lane.b32.xlu1 %v415_v9, %s358_s13 }
  0x95   :  { %136 = vrot.lane.b32.xlu0 %v420_v12, %s359_s14  ;;  %145 = vrot.lane.b32.xlu2 %v420_v12, %s357_s2 }
  0x96   :  { %163 = vrot.lane.b32.xlu1 %v420_v12, %s358_s13 }
  0x9d   :  { %125 = vrot.lane.b32.xlu0 %v415_v9, %s360_s0  ;;  %134 = vrot.lane.b32.xlu2 %v415_v9, %s359_s14 }
  0x9e   :  { %154 = vrot.lane.b32.xlu1 %v420_v12, %s356_s1 }
  0xa5   :  { %98 = vrot.lane.b32.xlu0 %v420_v12, %s361_s15  ;;  %118 = vrot.lane.b32.xlu2 %v420_v12, %s362_s16 }
  0xa6   :  { %116 = vrot.lane.b32.xlu1 %v415_v9, %s362_s16 }
  0xad   :  { %96 = vrot.lane.b32.xlu2 %v415_v9, %s361_s15 }
  0xae   :  { %127 = vrot.lane.b32.xlu1 %v420_v12, %s360_s0 }
  0xb5   :  { %109 = vrot.lane.b32.xlu2 %v420_v12, %s354_s6 }
  0xb6   :  { %107 = vrot.lane.b32.xlu1 %v415_v9, %s354_s6 }
  0xe7   :  { %v144_v13 = vpop.permute.xlu2 %143 }
  0xef   :  { %v146_v15 = vpop.permute.xlu2 %145 }
  0xf0   :  { %v148_v34 = vsel %vm147_vm2, %v144_v13, %v146_v15  ;;  %v149_v35 = vsel %vm147_vm2, %v146_v15, %v144_v13  ;;  %v60_v15 = vld [vmem:[#allocation6 + $0x10] sm:$0xff] }
  0xf1   :  { %v150_v45 = vmul.f32 %v148_v34, %v68_v29  ;;  %v151_v46 = vmul.f32 %v149_v35, %v69_v33 }
  0xf7   :  { %v135_v24 = vpop.permute.xlu2 %134 }
  0xff   :  { %v153_v18 = vpop.permute.xlu0 %152  ;;  %v119_v49 = vpop.permute.xlu2 %118 }
 0x100   :  { %v162_v16 = vpop.permute.xlu1 %161 }
 0x107   :  { %v137_v30 = vpop.permute.xlu0 %136  ;;  %v97_v58 = vpop.permute.xlu2 %96 }
 0x108   :  { %v164_v21 = vpop.permute.xlu1 %163  ;;  %v139_v41 = vsel %vm138_vm3, %v135_v24, %v137_v30  ;;  %v140_v42 = vsel %vm138_vm3, %v137_v30, %v135_v24 }
 0x109   :  { %v166_v22 = vsel %vm165_vm0, %v162_v16, %v164_v21  ;;  %v167_v23 = vsel %vm165_vm0, %v164_v21, %v162_v16  ;;  %v141_v50 = vmul.f32 %v139_v41, %v66_v39  ;;  %v142_v51 = vmul.f32 %v140_v42, %v67_v40  ;;  %v61_v16 = vld [vmem:[#allocation6 + $0x18] sm:$0xff] }
 0x10a   :  { %v168_v25 = vmul.f32 %v166_v22, %v72_v19  ;;  %v169_v26 = vmul.f32 %v167_v23, %v73_v20 }
 0x10b   :  { %v174_v55 = vpack.c.bf16 %v141_v50, %v415_v9  ;;  %v175_v56 = vpack.c.bf16 %v142_v51, %v420_v12  ;;  %v59_v12 = vld [vmem:[#allocation6 + $0x8] sm:$0xff] }
 0x10c   :  { %v178_v27 = vpack.c.bf16 %v168_v25, %v168_v25  ;;  %v179_v28 = vpack.c.bf16 %v169_v26, %v169_v26 }
 0x10e   :  { %v191_v31 = vsel %vm189_vm1, %v178_v27, 0  ;;  %v194_v32 = vsel %vm189_vm1, %v179_v28, 0  ;;  %v254_v28 = vld [vmem:[#allocation3] sm:$0xff] }
 0x10f   :  { %199 = vmatpush.bf16.msra.mxu0 %v191_v31  ;;  %213 = vmatpush.bf16.msra.mxu1 %v194_v32  ;;  %v126_v57 = vpop.permute.xlu0 %125 }
 0x110   :  { %v155_v38 = vpop.permute.xlu1 %154 }
 0x111   :  { %v157_v43 = vsel %vm156_vm4, %v153_v18, %v155_v38  ;;  %v158_v44 = vsel %vm156_vm4, %v155_v38, %v153_v18  ;;  %v110_v18 = vpop.permute.xlu2 %109 }
 0x112   :  { %v159_v47 = vmul.f32 %v157_v43, %v70_v36  ;;  %v160_v48 = vmul.f32 %v158_v44, %v71_v37 }
 0x114   :  { %v176_v52 = vpack.c.bf16 %v159_v47, %v150_v45  ;;  %v177_v53 = vpack.c.bf16 %v160_v48, %v151_v46 }
 0x116   :  { %200 = vmatpush.bf16.msra.mxu0 %v176_v52  ;;  %214 = vmatpush.bf16.msra.mxu1 %v177_v53 }
 0x117   :  { %v99_v8 = vpop.permute.xlu0 %98 }
 0x118   :  { %v117_v54 = vpop.permute.xlu1 %116  ;;  %v103_v13 = vsel %vm102_vm7, %v97_v58, %v99_v8  ;;  %v104_v14 = vsel %vm102_vm7, %v99_v8, %v97_v58 }
 0x119   :  { %v121_v61 = vsel %vm120_vm5, %v117_v54, %v119_v49  ;;  %v122_v62 = vsel %vm120_vm5, %v119_v49, %v117_v54  ;;  %v105_v22 = vmul.f32 %v104_v14, %v58_v11  ;;  %v106_v23 = vmul.f32 %v103_v13, %v59_v12 }
 0x11a   :  { %201 = vmatpush.bf16.msra.mxu0 %v174_v55  ;;  %215 = vmatpush.bf16.msra.mxu1 %v175_v56  ;;  %v123_v4 = vmul.f32 %v122_v62, %v62_v59  ;;  %v124_v5 = vmul.f32 %v121_v61, %v63_v60 }
 0x120   :  { %v128_v1 = vpop.permute.xlu1 %127 }
 0x121   :  { %v130_v2 = vsel %vm129_vm6, %v126_v57, %v128_v1  ;;  %v131_v3 = vsel %vm129_vm6, %v128_v1, %v126_v57 }
 0x122   :  { %v132_v6 = vmul.f32 %v131_v3, %v64_v63  ;;  %v133_v7 = vmul.f32 %v130_v2, %v65_v0 }
 0x124   :  { %v172_v9 = vpack.c.bf16 %v132_v6, %v123_v4  ;;  %v173_v10 = vpack.c.bf16 %v133_v7, %v124_v5 }
 0x126   :  { %202 = vmatpush.bf16.msra.mxu0 %v172_v9  ;;  %216 = vmatpush.bf16.msra.mxu1 %v173_v10 }
 0x128   :  { %v108_v19 = vpop.permute.xlu1 %107 }
 0x129   :  { %v112_v20 = vsel %vm111_vm8, %v108_v19, %v110_v18  ;;  %v113_v21 = vsel %vm111_vm8, %v110_v18, %v108_v19 }
 0x12a   :  { %v114_v24 = vmul.f32 %v113_v21, %v60_v15  ;;  %v115_v25 = vmul.f32 %v112_v20, %v61_v16 }
 0x12c   :  { %v170_v26 = vpack.c.bf16 %v114_v24, %v105_v22  ;;  %v171_v27 = vpack.c.bf16 %v115_v25, %v106_v23 }
 0x12e   :  { %203 = vmatpush.bf16.msra.mxu0 %v170_v26  ;;  %217 = vmatpush.bf16.msra.mxu1 %v171_v27 }
 0x131   :  { %252 = vmatmul.msk.bf16.vlgmr.msra.gmra.mxu0 %vm185_vm9, %v254_v28  ;;  %253 = vmatmul.msk.bf16.vlgmr.msra.gmra.mxu1 %vm185_vm9, %v254_v28 }
 0x1ae   :  { %v205_v17 = vpop.f32.mrf.mxu0  ;;  %v219_v29 = vpop.f32.mrf.mxu1 }
 0x1af   :  { %224 = vst [vmem:[#allocation8] sm:$0xff] %v205_v17 }
 0x1b0   :  { %225 = vst [vmem:[#allocation8 + $0x8] sm:$0xff] %v219_v29 }
 0x1b6   :  { %v207_v30 = vpop.f32.mrf.mxu0  ;;  %v221_v31 = vpop.f32.mrf.mxu1 }
 0x1b7   :  { %226 = vst [vmem:[#allocation8 + $0x10] sm:$0xff] %v207_v30 }
 0x1b8   :  { %227 = vst [vmem:[#allocation8 + $0x18] sm:$0xff] %v221_v31 }
 0x1b9   :  { %240 = dma.vmem_to_hbm [thread:$0]  %s233_s18, 512, %s235_s21, [#allocation5], %s353_s30, %s353_s30, %s354_s6  }
 0x1ba   :  { %347 = dma.done.wait [#allocation5], 512  }
 0x1bb   :  { %348 = vsyncadd [#allocation5], 4294966784 }
 0x1bc   :  { %245 = vsyncpa [#allocation4], 1 }
 0x1bd   :  { %246 = vsyncpa [#allocation7], 1 }
 0x1be   :  { %247 = vsyncpa [#allocation5], 1 }

</bundles_post_ra>
